<compile_context>
chip_gen: v7x
topology: tpu7x:2x2x1
jax: 0.10.0
libtpu: 0.0.40
codegen_flags: <defaults>
</compile_context>

<pallas_src>
import functools

import jax
import jax.numpy as jnp
from jax.experimental import pallas as pl
from jax.experimental.pallas import tpu as pltpu


def _round_up(v, m):
    return (v + m - 1) // m * m


def _gcn_kernel(a_ref, feat_ref, w1b_ref, p_ref, wlb_ref, o_ref, acc_ref,
                *, c_feat, hidden, has_proj):
    """One row-tile of nodes per grid step; pooled accumulator lives in VMEM."""
    i = pl.program_id(0)

    @pl.when(i == 0)
    def _init():
        acc_ref[...] = jnp.zeros_like(acc_ref)

    # Aggregate this row-tile of A_hat against the (possibly pre-projected)
    # node features: narrow contraction width = min(F_in, H).
    agg = jnp.dot(a_ref[...], feat_ref[...], preferred_element_type=jnp.float32)

    if has_proj:
        # h = (A @ X) @ W1 + b1   (bias row is stacked under W1)
        h = (jnp.dot(agg, w1b_ref[:c_feat, :], preferred_element_type=jnp.float32)
             + w1b_ref[c_feat:c_feat + 1, :])
    else:
        # features were pre-projected (X @ W1) in the wrapper; just add bias
        h = agg + w1b_ref[0:1, :]

    # ReLU; F.dropout(p=0.5, training=False) is identity at inference.
    h = jnp.maximum(h, 0.0)

    # Accumulate this tile's contribution to global_mean_pool: P[:, tile] @ h
    acc_ref[...] += jnp.dot(p_ref[...], h, preferred_element_type=jnp.float32)

    @pl.when(i == pl.num_programs(0) - 1)
    def _finalize():
        # Final Linear: pooled @ Wl + bl (bias row stacked under Wl),
        # written as a lane-dense (G_pad, O_pad) block.
        out = (jnp.dot(acc_ref[...], wlb_ref[:hidden, :],
                       preferred_element_type=jnp.float32)
               + wlb_ref[hidden:hidden + 1, :])
        o_ref[...] = out.astype(o_ref.dtype)


def simple_gcn_forward(a_hat, x, w1, b1, pool_mat, w_lin, b_lin,
                       *, compute_dtype=jnp.float32):
    """Fused SimpleGCN forward. compute_dtype=bf16 is a further lever for
    large N (keep f32 accumulation via preferred_element_type)."""
    N, F_in = x.shape
    H = w1.shape[1]
    G = pool_mat.shape[0]
    O = w_lin.shape[1]

    # --- trace-time matmul ordering: contract A_hat on the narrower width ----
    has_proj = F_in <= H
    if has_proj:
        feat = x                                         # (N, F_in)
        w1b = jnp.concatenate([w1, b1], axis=0)          # (F_in + 1, H)
        c_feat = F_in
    else:
        feat = x @ w1                                    # project once in XLA
        w1b = b1                                         # (1, H) bias only
        c_feat = H

    # --- lane/sublane-dense padding ------------------------------------------
    G_pad = max(8, _round_up(G, 8))
    O_pad = _round_up(O, 128)

    # --- row tiling of A_hat (bounded VMEM as N grows) ------------------------
    if N <= 1024:
        tm = _round_up(N, 8)          # single row tile (full-extent blocks)
        N_pad = tm
    else:
        tm = 512                      # multiple of (8, 128); pipelined over rows
        N_pad = _round_up(N, tm)
    n_tiles = N_pad // tm

    cd = compute_dtype
    a_p = jnp.zeros((N_pad, N_pad), cd).at[:N, :N].set(a_hat.astype(cd))
    feat_p = jnp.zeros((N_pad, c_feat), cd).at[:N, :].set(feat.astype(cd))
    p_p = jnp.zeros((G_pad, N_pad), cd).at[:G, :N].set(pool_mat.astype(cd))
    w1b_p = w1b.astype(cd)
    wlb = jnp.zeros((H + 1, O_pad), cd)
    wlb = wlb.at[:H, :O].set(w_lin.astype(cd))
    wlb = wlb.at[H:H + 1, :O].set(b_lin.astype(cd))

    kernel = functools.partial(_gcn_kernel, c_feat=c_feat, hidden=H,
                               has_proj=has_proj)

    out_padded = pl.pallas_call(
        kernel,
        out_shape=jax.ShapeDtypeStruct((G_pad, O_pad), jnp.float32),
        grid_spec=pltpu.PrefetchScalarGridSpec(
            num_scalar_prefetch=0,
            grid=(n_tiles,),
            in_specs=[
                pl.BlockSpec((tm, N_pad), lambda i: (i, 0)),       # A_hat row tile
                pl.BlockSpec((N_pad, c_feat), lambda i: (0, 0)),   # features (resident)
                pl.BlockSpec(w1b_p.shape, lambda i: (0, 0)),       # [W1; b1] (resident)
                pl.BlockSpec((G_pad, tm), lambda i: (0, i)),       # pooling column tile
                pl.BlockSpec((H + 1, O_pad), lambda i: (0, 0)),    # [Wl; bl] (resident)
            ],
            out_specs=pl.BlockSpec((G_pad, O_pad), lambda i: (0, 0)),
            scratch_shapes=[pltpu.VMEM((G_pad, H), jnp.float32)],  # pooled accumulator
        ),
        compiler_params=pltpu.CompilerParams(
            # Row axis is a reduction into the pooled accumulator -> "arbitrary".
            dimension_semantics=("arbitrary",),
            vmem_limit_bytes=48 * 1024 * 1024,
        ),
    )(a_p, feat_p, w1b_p, p_p, wlb)

    return out_padded[:G, :O]


def build_normalized_adjacency(edge_index, num_nodes):
    """PyG GCNConv default: add self loops, symmetric normalization.
    (Host-side glue; dense formulation. For large sparse graphs a
    scalar-prefetched neighbor-table kernel would avoid the O(N^2) A_hat.)"""
    src, dst = edge_index[0], edge_index[1]
    adj = jnp.zeros((num_nodes, num_nodes), jnp.float32)
    adj = adj.at[src, dst].set(1.0)
    adj = adj + jnp.eye(num_nodes, dtype=jnp.float32)  # add self loops
    deg = jnp.sum(adj, axis=1)
    d_inv_sqrt = jnp.where(deg > 0, 1.0 / jnp.sqrt(deg), 0.0)
    return d_inv_sqrt[:, None] * adj * d_inv_sqrt[None, :]


def build_pool_matrix(batch, num_graphs, num_nodes):
    """global_mean_pool as a (G, N) matrix with 1/count_g entries."""
    onehot = (batch[None, :] == jnp.arange(num_graphs)[:, None]).astype(jnp.float32)
    counts = jnp.maximum(jnp.sum(onehot, axis=1, keepdims=True), 1.0)
    return onehot / counts


if __name__ == "__main__":
    # Small shapes consistent with the module: num_layers=2 -> single GCNConv.
    N = 16            # nodes (many graphs per call would amortize overhead)
    F_IN = 8          # num_node_features
    H = 32            # hidden_channels
    OUT = 4           # output_channels
    G = 2             # number of graphs in the batch

    key = jax.random.PRNGKey(0)
    k_x, k_w1, k_b1, k_wl, k_bl, k_e = jax.random.split(key, 6)

    # Node features
    x = jax.random.normal(k_x, (N, F_IN), dtype=jnp.float32)

    # Deterministic synthetic (symmetric) edge set: a ring over all nodes.
    src = jnp.arange(N, dtype=jnp.int32)
    dst = (src + 1) % N
    edge_index = jnp.stack(
        [jnp.concatenate([src, dst]), jnp.concatenate([dst, src])], axis=0
    )

    # Batch assignment: first half graph 0, second half graph 1.
    batch = jnp.concatenate(
        [jnp.zeros(N // 2, jnp.int32), jnp.ones(N - N // 2, jnp.int32)]
    )

    # Deterministic parameter init (synthetic, Glorot-ish scaling).
    w1 = jax.random.normal(k_w1, (F_IN, H), dtype=jnp.float32) * (1.0 / jnp.sqrt(F_IN))
    b1 = jax.random.normal(k_b1, (1, H), dtype=jnp.float32) * 0.01
    w_lin = jax.random.normal(k_wl, (H, OUT), dtype=jnp.float32) * (1.0 / jnp.sqrt(H))
    b_lin = jax.random.normal(k_bl, (1, OUT), dtype=jnp.float32) * 0.01

    # Glue: dense normalized adjacency + pooling matrix (plain JAX).
    a_hat = build_normalized_adjacency(edge_index, N)
    pool_mat = build_pool_matrix(batch, G, N)

    out = simple_gcn_forward(a_hat, x, w1, b1, pool_mat, w_lin, b_lin)
    out = jax.block_until_ready(out)

    # Pure-JAX reference of the same forward semantics (original ordering).
    h_ref = jnp.maximum(a_hat @ (x @ w1) + b1, 0.0)
    ref = pool_mat @ h_ref @ w_lin + b_lin
    assert out.shape == (G, OUT)
    assert jnp.allclose(out, ref, atol=1e-4, rtol=1e-4)

    print("KERNEL_OK")
</pallas_src>

<mosaic_0001>
module attributes {stable_mosaic.version = 11 : i64} {
  func.func @_gcn_kernel(%arg0: i32, %arg1: memref<16x16xf32, #tpu.memory_space<vmem>>, %arg2: memref<16x8xf32, #tpu.memory_space<vmem>>, %arg3: memref<9x32xf32, #tpu.memory_space<vmem>>, %arg4: memref<8x16xf32, #tpu.memory_space<vmem>>, %arg5: memref<33x128xf32, #tpu.memory_space<vmem>>, %arg6: memref<8x128xf32, #tpu.memory_space<vmem>>, %arg7: memref<8x32xf32, #tpu.memory_space<vmem>>) attributes {dimension_semantics = [#tpu.dimension_semantics<arbitrary>], iteration_bounds = array<i64: 1>, scalar_prefetch = 0 : i64, scratch_operands = 1 : i64, tpu.core_type = #tpu.core_type<tc>, window_params = [{transform_indices = @transform_0, window_bounds = array<i64: 16, 16>}, {pipeline_mode = #tpu.pipeline_mode<synchronous>, transform_indices = @transform_1, window_bounds = array<i64: 16, 8>}, {pipeline_mode = #tpu.pipeline_mode<synchronous>, transform_indices = @transform_2, window_bounds = array<i64: 9, 32>}, {transform_indices = @transform_3, window_bounds = array<i64: 8, 16>}, {pipeline_mode = #tpu.pipeline_mode<synchronous>, transform_indices = @transform_4, window_bounds = array<i64: 33, 128>}, {pipeline_mode = #tpu.pipeline_mode<synchronous>, transform_indices = @transform_5, window_bounds = array<i64: 8, 128>}]} {
    %c0_i32 = arith.constant 0 : i32
    %0 = arith.cmpi eq, %arg0, %c0_i32 : i32
    %1 = arith.extui %0 : i1 to i32
    %c0_i32_0 = arith.constant 0 : i32
    %2 = arith.cmpi ne, %1, %c0_i32_0 : i32
    scf.if %2 {
      %cst_18 = arith.constant 0.000000e+00 : f32
      %21 = vector.broadcast %cst_18 : f32 to vector<8x32xf32>
      %c0_19 = arith.constant 0 : index
      %c0_20 = arith.constant 0 : index
      %22 = vector.load %arg7[%c0_19, %c0_20] : memref<8x32xf32, #tpu.memory_space<vmem>>, vector<8x32xf32>
      tpu.vector_store %arg7[%c0_19, %c0_20], %21 {strides = array<i32>} : memref<8x32xf32, #tpu.memory_space<vmem>>, vector<8x32xf32>,
    } else {
    }
    %c0 = arith.constant 0 : index
    %c0_1 = arith.constant 0 : index
    %3 = vector.load %arg1[%c0, %c0_1] : memref<16x16xf32, #tpu.memory_space<vmem>>, vector<16x16xf32>
    %c0_2 = arith.constant 0 : index
    %c0_3 = arith.constant 0 : index
    %4 = vector.load %arg2[%c0_2, %c0_3] : memref<16x8xf32, #tpu.memory_space<vmem>>, vector<16x8xf32>
    %cst = arith.constant dense<0.000000e+00> : vector<16x8xf32>
    %5 = tpu.matmul %3, %4, %cst {dimension_numbers = #tpu.dot_dimension_numbers<[1], [0], [0], [1], [0, 0, 1, 1], [], []>} : vector<16x16xf32>, vector<16x8xf32>, vector<16x8xf32> -> vector<16x8xf32>
    %c0_4 = arith.constant 0 : index
    %c0_5 = arith.constant 0 : index
    %6 = vector.load %arg3[%c0_4, %c0_5] : memref<9x32xf32, #tpu.memory_space<vmem>>, vector<8x32xf32>
    %cst_6 = arith.constant dense<0.000000e+00> : vector<16x32xf32>
    %7 = tpu.matmul %5, %6, %cst_6 {dimension_numbers = #tpu.dot_dimension_numbers<[1], [0], [0], [1], [0, 0, 1, 1], [], []>} : vector<16x8xf32>, vector<8x32xf32>, vector<16x32xf32> -> vector<16x32xf32>
    %c8 = arith.constant 8 : index
    %c0_7 = arith.constant 0 : index
    %8 = vector.load %arg3[%c8, %c0_7] : memref<9x32xf32, #tpu.memory_space<vmem>>, vector<1x32xf32>
    %9 = vector.broadcast %8 : vector<1x32xf32> to vector<16x32xf32>
    %10 = arith.addf %7, %9 : vector<16x32xf32>
    %cst_8 = arith.constant 0.000000e+00 : f32
    %11 = vector.broadcast %cst_8 : f32 to vector<16x32xf32>
    %12 = arith.maximumf %10, %11 : vector<16x32xf32>
    %c0_9 = arith.constant 0 : index
    %c0_10 = arith.constant 0 : index
    %13 = vector.load %arg7[%c0_9, %c0_10] : memref<8x32xf32, #tpu.memory_space<vmem>>, vector<8x32xf32>
    %c0_11 = arith.constant 0 : index
    %c0_12 = arith.constant 0 : index
    %14 = vector.load %arg4[%c0_11, %c0_12] : memref<8x16xf32, #tpu.memory_space<vmem>>, vector<8x16xf32>
    %cst_13 = arith.constant dense<0.000000e+00> : vector<8x32xf32>
    %15 = tpu.matmul %14, %12, %cst_13 {dimension_numbers = #tpu.dot_dimension_numbers<[1], [0], [0], [1], [0, 0, 1, 1], [], []>} : vector<8x16xf32>, vector<16x32xf32>, vector<8x32xf32> -> vector<8x32xf32>
    %16 = arith.addf %13, %15 : vector<8x32xf32>
    %c0_14 = arith.constant 0 : index
    %c0_15 = arith.constant 0 : index
    %17 = vector.load %arg7[%c0_14, %c0_15] : memref<8x32xf32, #tpu.memory_space<vmem>>, vector<8x32xf32>
    tpu.vector_store %arg7[%c0_14, %c0_15], %16 {strides = array<i32>} : memref<8x32xf32, #tpu.memory_space<vmem>>, vector<8x32xf32>,
    %c0_i32_16 = arith.constant 0 : i32
    %18 = arith.cmpi eq, %arg0, %c0_i32_16 : i32
    %19 = arith.extui %18 : i1 to i32
    %c0_i32_17 = arith.constant 0 : i32
    %20 = arith.cmpi ne, %19, %c0_i32_17 : i32
    scf.if %20 {
      %c0_18 = arith.constant 0 : index
      %c0_19 = arith.constant 0 : index
      %21 = vector.load %arg7[%c0_18, %c0_19] : memref<8x32xf32, #tpu.memory_space<vmem>>, vector<8x32xf32>
      %c0_20 = arith.constant 0 : index
      %c0_21 = arith.constant 0 : index
      %22 = vector.load %arg5[%c0_20, %c0_21] : memref<33x128xf32, #tpu.memory_space<vmem>>, vector<32x128xf32>
      %cst_22 = arith.constant dense<0.000000e+00> : vector<8x128xf32>
      %23 = tpu.matmul %21, %22, %cst_22 {dimension_numbers = #tpu.dot_dimension_numbers<[1], [0], [0], [1], [0, 0, 1, 1], [], []>} : vector<8x32xf32>, vector<32x128xf32>, vector<8x128xf32> -> vector<8x128xf32>
      %c32 = arith.constant 32 : index
      %c0_23 = arith.constant 0 : index
      %24 = vector.load %arg5[%c32, %c0_23] : memref<33x128xf32, #tpu.memory_space<vmem>>, vector<1x128xf32>
      %25 = vector.broadcast %24 : vector<1x128xf32> to vector<8x128xf32>
      %26 = arith.addf %23, %25 : vector<8x128xf32>
      %c0_24 = arith.constant 0 : index
      %c0_25 = arith.constant 0 : index
      %27 = vector.load %arg6[%c0_24, %c0_25] : memref<8x128xf32, #tpu.memory_space<vmem>>, vector<8x128xf32>
      tpu.vector_store %arg6[%c0_24, %c0_25], %26 {strides = array<i32>} : memref<8x128xf32, #tpu.memory_space<vmem>>, vector<8x128xf32>,
    } else {
    }
    return
  }
  func.func @transform_0(%arg0: i32) -> (i32, i32) {
    %c0_i32 = arith.constant 0 : i32
    %c0_i32_0 = arith.constant 0 : i32
    return %arg0, %c0_i32 : i32, i32
  }
  func.func @transform_1(%arg0: i32) -> (i32, i32) {
    %c0_i32 = arith.constant 0 : i32
    %c0_i32_0 = arith.constant 0 : i32
    %c0_i32_1 = arith.constant 0 : i32
    return %c0_i32, %c0_i32_0 : i32, i32
  }
  func.func @transform_2(%arg0: i32) -> (i32, i32) {
    %c0_i32 = arith.constant 0 : i32
    %c0_i32_0 = arith.constant 0 : i32
    %c0_i32_1 = arith.constant 0 : i32
    return %c0_i32, %c0_i32_0 : i32, i32
  }
  func.func @transform_3(%arg0: i32) -> (i32, i32) {
    %c0_i32 = arith.constant 0 : i32
    %c0_i32_0 = arith.constant 0 : i32
    return %c0_i32, %arg0 : i32, i32
  }
  func.func @transform_4(%arg0: i32) -> (i32, i32) {
    %c0_i32 = arith.constant 0 : i32
    %c0_i32_0 = arith.constant 0 : i32
    %c0_i32_1 = arith.constant 0 : i32
    return %c0_i32, %c0_i32_0 : i32, i32
  }
  func.func @transform_5(%arg0: i32) -> (i32, i32) {
    %c0_i32 = arith.constant 0 : i32
    %c0_i32_0 = arith.constant 0 : i32
    %c0_i32_1 = arith.constant 0 : i32
    return %c0_i32, %c0_i32_0 : i32, i32
  }
}

</mosaic_0001>

<bundles_post_ra>
// kernel: tpu_custom_call.1
= control target key start
LH: loop header
LB: loop body
LE: loop exit
PB: predicated region body
PF: predicated region fallthrough
CT: control target
= control target key end

     0   :  { %10 = vsyncpa [#allocation4], 0  ;;  %s653_s0 = inlined_call_operand.vmem [shape: f32[16,16], index: 0, kind: input, shape index: {}]   ;;  %s654_s1 = inlined_call_operand.vmem [shape: f32[16,8], index: 1, kind: input, shape index: {}]   ;;  %s655_s2 = inlined_call_operand.hbm [shape: f32[9,32], index: 2, kind: input, shape index: {}]   ;;  %s656_s3 = inlined_call_operand.vmem [shape: f32[8,16], index: 3, kind: input, shape index: {}]   ;;  %s657_s4 = inlined_call_operand.hbm [shape: f32[33,128], index: 4, kind: input, shape index: {}]   ;;  %s658_s5 = inlined_call_operand.hbm [shape: f32[8,128], index: 5, kind: output, shape index: {}]  }
   0x1   :  { %11 = vsyncpa [#allocation7], 0 }
   0x2   :  { %12 = vsyncpa [#allocation5], 0  ;;  %s558_s18 = smov [#allocation3]   ;;  %s486_s22 = scalar_lea.hbm %s655_s2, 256 }
   0x3   :  { %s22_s19 = sshll.u32 %s558_s18, 4  ;;  %p487_p0 = scmp.ne.s32.totalorder %s655_s2, %s486_s22  ;;  %s23_s19 = int_to_ptr.vmem [resolvable:$true] %s22_s19 }
   0x4   :  { %p490_p1 = scmp.lt.u32.totalorder %s486_s22, %s655_s2 }
   0x6   :  { %p492_p2 = pnand %p490_p1, %p487_p0 }
   0x8   :  { %495 = shalt.err (!%p492_p2)
}
   0x9   :  { %s496_s27 = scalar_lea.vmem %s23_s19, 256  ;;  %p501_p4 = scmp.lt.s32.totalorder %s23_s19, %s23_s19 }
   0xa   :  { %p497_p3 = scmp.ne.s32.totalorder %s23_s19, %s496_s27  ;;  %p502_p5 = scmp.lt.s32.totalorder %s496_s27, %s496_s27 }
   0xc   :  { %p503_p6 = por %p502_p5, %p501_p4 }
   0xe   :  { %p504_p7 = pnand %p503_p6, %p497_p3 }
  0x10   :  { %507 = shalt.err (!%p504_p7)
}
  0x11   :  { %s559_s28 = smov 128   ;;  %s560_s29 = smov 8  }
  0x12   :  { %28 = dma.hbm_to_vmem [thread:$0]  %s655_s2, 256, %s23_s19, [#allocation4], %s559_s28, %s559_s28, %s560_s29  }
  0x13   :  { %s561_s7 = smov [#allocation6]   ;;  %s508_s11 = scalar_lea.hbm %s657_s4, 640 }
  0x14   :  { %s36_s8 = sshll.u32 %s561_s7, 4  ;;  %p509_p8 = scmp.ne.s32.totalorder %s657_s4, %s508_s11  ;;  %s37_s8 = int_to_ptr.vmem [resolvable:$true] %s36_s8 }
  0x15   :  { %p512_p9 = scmp.lt.u32.totalorder %s508_s11, %s657_s4 }
  0x17   :  { %p514_p10 = pnand %p512_p9, %p509_p8 }
  0x19   :  { %517 = shalt.err (!%p514_p10)
}
  0x1a   :  { %s518_s16 = scalar_lea.vmem %s37_s8, 640  ;;  %p523_p12 = scmp.lt.s32.totalorder %s37_s8, %s37_s8 }
  0x1b   :  { %p519_p11 = scmp.ne.s32.totalorder %s37_s8, %s518_s16  ;;  %p524_p13 = scmp.lt.s32.totalorder %s518_s16, %s518_s16 }
  0x1d   :  { %p525_p0 = por %p524_p13, %p523_p12 }
  0x1f   :  { %p526_p1 = pnand %p525_p0, %p519_p11 }
  0x21   :  { %529 = shalt.err (!%p526_p1)
}
  0x22   :  { %42 = dma.hbm_to_vmem [thread:$0]  %s657_s4, 640, %s37_s8, [#allocation7], %s559_s28, %s559_s28, %s560_s29  }
  0x23   :  { %552 = dma.done.wait [#allocation4], 256  }
  0x24   :  { %553 = vsyncadd [#allocation4], 4294967040 }
  0x25   :  { %554 = dma.done.wait [#allocation7], 640  }
  0x26   :  { %555 = vsyncadd [#allocation7], 4294966656  ;;  %vm59_vm0 = vcmask 130048   ;;  %v57_v0 = vld [vmem:[%s654_s1] sm:$0xff]  ;;  %v58_v1 = vld [vmem:[%s654_s1 + $0x8] sm:$0xff]  ;;  %vm147_vm1 = vcmask 64512  }
  0x27   :  { %v55_v2 = vld [vmem:[%s653_s0] sm:$0xff]  ;;  %v465_v3 = vpack.c.bf16 %v58_v1, %v57_v0  ;;  %v56_v4 = vld [vmem:[%s653_s0 + $0x8] sm:$0xff]  ;;  %v562_v8 = vmov 0.0|0.0   ;;  %vm53_vm2 = vcmask 261120   ;;  %v563_v9 = vmov 0.0   ;;  %v313_v19 = vld [vmem:[#allocation6] sm:$0xff] }
  0x28   :  { %439 = vmatprep.mubr.msk.f32.mxu0 %vm59_vm0, %v55_v2  ;;  %v141_v5 = vld [vmem:[#allocation3] sm:$0xff]  ;;  %54 = vst.msk [vmem:[#allocation2] sm:$0xff] %vm53_vm2, %v563_v9  ;;  %vm564_vm3 = vmmov 0   ;;  %v414_v10 = vld [vmem:[#allocation3 + $0x8] ss:$0 sm:$0xff]  ;;  %v232_v18 = vld [vmem:[%s656_s3] sm:$0xff] }
  0x29   :  { %466 = vmatprep.subr.bf16.mxu0 %v465_v3  ;;  %442 = vmatprep.subr.mxu1 %v141_v5  ;;  %v314_v20 = vld [vmem:[#allocation6 + $0x8] sm:$0xff]  ;;  %v315_v22 = vld [vmem:[#allocation6 + $0x10] sm:$0xff]  ;;  %v316_v23 = vld [vmem:[#allocation6 + $0x18] sm:$0xff]  ;;  %s565_s3 = smov [#allocation8]  }
  0x2a   :  { %468 = vmatpush3.bf16.msra.mxu0 %v465_v3  ;;  %443 = vmatpush3.msra.mxu1 %v141_v5  ;;  %v473_v21 = vpack.c.bf16 %v314_v20, %v313_v19  ;;  %v476_v24 = vpack.c.bf16 %v316_v23, %v315_v22  ;;  %v418_v30 = vld [vmem:[#allocation6 + $0x20] ss:$0 sm:$0xff]  ;;  %s402_s25 = sshll.u32 %s565_s3, 4  ;;  %s403_s25 = int_to_ptr.vmem [resolvable:$true] %s402_s25 }
  0x2b   :  { %469 = vmatprep.subr.bf16.mxu1 %v562_v8  ;;  %472 = vmatprep.subr.bf16.mxu0 %v562_v8  ;;  %s530_s26 = scalar_lea.vmem %s403_s25, 128  ;;  %p535_p3 = scmp.lt.s32.totalorder %s403_s25, %s403_s25 }
  0x2c   :  { %p531_p2 = scmp.ne.s32.totalorder %s403_s25, %s530_s26  ;;  %p536_p4 = scmp.lt.s32.totalorder %s530_s26, %s530_s26 }
  0x2d   :  { %440 = vmatmul.mubr.msk.f32.vlgmr.msra.gmra.mrb[0].mxu0 %vm59_vm0, %v56_v4 }
  0x2e   :  { %462 = vmatprep.mubr.msk.f32.mxu0 %vm564_vm3, %v563_v9  ;;  %474 = vmatpush3.bf16.msra.mxu0 %v473_v21  ;;  %p537_p5 = por %p536_p4, %p535_p3 }
  0x2f   :  { %475 = vmatprep.subr.bf16.mxu0 %v562_v8  ;;  %v231_v25 = vld [vmem:[#allocation2] sm:$0xff] }
  0x30   :  { %p538_p6 = pnand %p537_p5, %p531_p2 }
  0x32   :  { %477 = vmatpush3.bf16.msra.mxu0 %v476_v24 }
 0x100   :  { %v441_v6 = vpop.f32.mrb[0].mxu0 }
 0x101   :  { %v132_v7 = vpop.f32.mrb[1].mxu0 }
 0x102   :  { %444 = vmatprep.mubr.msk.f32.mxu1 %vm147_vm1, %v132_v7 }
 0x103   :  { %445 = vmatmul.mubr.msk.f32.vlgmr.msra.gmra.mrb[0].mxu1 %vm147_vm1, %v441_v6 }
 0x104   :  { %451 = vmatprep.mubr.msk.f32.mxu1 %vm564_vm3, %v563_v9 }
 0x1d6   :  { %v446_v11 = vpop.f32.mrb[0].mxu1 }
 0x1d7   :  { %v226_v12 = vadd.f32 %v446_v11, %v414_v10  ;;  %v220_v13 = vpop.f32.mrb[1].mxu1 }
 0x1d8   :  { %v221_v14 = vadd.f32 %v414_v10, %v220_v13 }
 0x1d9   :  { %v230_v15 = vmax.f32 %v226_v12, 0.0 }
 0x1da   :  { %v229_v16 = vmax.f32 %v221_v14, 0.0 }
 0x1dc   :  { %v470_v17 = vpack.c.bf16 %v230_v15, %v229_v16 }
 0x1de   :  { %471 = vmatpush3.bf16.msra.mxu1 %v470_v17 }
 0x1e1   :  { %452 = vmatmul.mubr.msk.f32.vlgmr.msra.gmra.mrb[2].mxu1 %vm59_vm0, %v232_v18 }
 0x2b4   :  { %v302_v26 = vpop.f32.mrb[2].mxu1 }
 0x2b5   :  { %v306_v27 = vadd.f32 %v302_v26, %v231_v25  ;;  %v453_v28 = vpop.f32.mrb[3].mxu1 }
 0x2b7   :  { %308 = vst.msk [vmem:[#allocation2] sm:$0xff] %vm53_vm2, %v306_v27 }
 0x2be   :  { %v312_v29 = vld [vmem:[#allocation2] sm:$0xff] }
 0x2bf   :  { %463 = vmatmul.mubr.msk.f32.vlgmr.msra.gmra.mrb[2].mxu0 %vm53_vm2, %v312_v29 }
 0x392   :  { %v391_v31 = vpop.f32.mrb[2].mxu0 }
 0x393   :  { %v392_v32 = vadd.f32 %v418_v30, %v391_v31  ;;  %v464_v33 = vpop.f32.mrb[3].mxu0 }
 0x395   :  { %395 = vst [vmem:[#allocation8] sm:$0xff] %v392_v32 }
 0x396   :  { %541 = shalt.err (!%p538_p6)
}
 0x397   :  { %s542_s29 = scalar_lea.hbm %s658_s5, 128 }
 0x398   :  { %p543_p7 = scmp.ne.s32.totalorder %s658_s5, %s542_s29  ;;  %p546_p8 = scmp.lt.u32.totalorder %s542_s29, %s658_s5 }
 0x39a   :  { %p548_p9 = pnand %p546_p8, %p543_p7 }
 0x39c   :  { %551 = shalt.err (!%p548_p9)
}
 0x39d   :  { %405 = dma.vmem_to_hbm [thread:$0]  %s403_s25, 128, %s658_s5, [#allocation5]  }
 0x39e   :  { %556 = dma.done.wait [#allocation5], 128  }
 0x39f   :  { %557 = vsyncadd [#allocation5], 4294967168 }
 0x3a0   :  { %409 = vsyncpa [#allocation4], 1 }
 0x3a1   :  { %410 = vsyncpa [#allocation7], 1 }
 0x3a2   :  { %411 = vsyncpa [#allocation5], 1 }

</bundles_post_ra>
